<compile_context>
chip_gen: v7x
topology: tpu7x:2x2x1
jax: 0.10.0
libtpu: 0.0.40
codegen_flags: <defaults>
</compile_context>

<pallas_src>
import functools

import jax
import jax.numpy as jnp
from jax.experimental import pallas as pl
from jax.experimental.pallas import tpu as pltpu


def _round_up(x, m):
    return (x + m - 1) // m * m


def _fused_sage_kernel(a_hbm, x_hbm, w_ref, b_ref, logits_ref, emb_ref,
                       a_vmem, hcat_ref, *, num_layers, dp):
    """One grid step == one SAGEConv('mean') layer; everything hot stays in VMEM.

    a_hbm     : (Np, Np) bf16   row-normalized dense adjacency (HBM, copied once)
    x_hbm     : (Np, Dp) bf16   padded input features (HBM, copied once into hcat)
    w_ref     : (1, 2*Dp, Dp)   per-layer stacked [W_self ; W_neigh], bf16
    b_ref     : (1, 1, Dp) f32  per-layer bias
    logits_ref: (Np, Dp) f32    final-layer output (written at l == L-1)
    emb_ref   : (Np, Dp) f32    second-to-last layer output after ReLU (l == L-2)
    a_vmem    : (Np, Np) bf16   single-buffered resident adjacency
    hcat_ref  : (Np, 2*Dp) bf16 left half = h (carried), right half = A_hat @ h
    """
    l = pl.program_id(0)

    @pl.when(l == 0)
    def _():
        # One-time DMAs: adjacency + initial features become resident for all layers.
        pltpu.sync_copy(a_hbm, a_vmem)
        pltpu.sync_copy(x_hbm, hcat_ref.at[:, :dp])

    # Neighbor mean aggregation on the MXU: A_hat @ h  (bf16 in, f32 accumulate).
    agg = jnp.dot(a_vmem[...], hcat_ref[:, :dp],
                  preferred_element_type=jnp.float32)
    # Stash agg next to h so the fused projection reads [h | agg] with no concatenate.
    hcat_ref[:, dp:] = agg.astype(jnp.bfloat16)

    # Fused self + neighbor projection: [h | agg] @ [W_self ; W_neigh] + bias.
    out = jnp.dot(hcat_ref[...], w_ref[0],
                  preferred_element_type=jnp.float32) + b_ref[0]
    out_relu = jnp.maximum(out, 0.0)

    # Carry activations (ReLU applied on all but the last layer), bf16 for the MXU.
    @pl.when(l < num_layers - 1)
    def _():
        hcat_ref[:, :dp] = out_relu.astype(jnp.bfloat16)

    # g.ndata['emb'] = h  (after activation; dropout is identity at eval). f32.
    @pl.when(l == num_layers - 2)
    def _():
        emb_ref[...] = out_relu

    # Final layer logits (no activation).
    @pl.when(l == num_layers - 1)
    def _():
        logits_ref[...] = out


def graphsage2_forward(a_hat, inputs, params):
    """GraphSAGE2.forward (eval mode). Returns (logits, emb).

    a_hat : (N, N) f32 row-normalized dense adjacency (A_hat[i, j] != 0 iff edge j->i).
    inputs: (N, in_feats) f32 node features.
    params: list of (w_self (Din,Dout), w_neigh (Din,Dout), bias (1,Dout)) per layer.
    """
    N, in_feats = inputs.shape
    L = len(params)
    # GraphSAGE2 always stacks >= 2 SAGEConv layers (in->hidden, ..., hidden->classes);
    # the emb output (second-to-last layer) is undefined otherwise.
    assert L >= 2, "graphsage2_forward requires at least 2 SAGEConv layers"
    out_dims = [w.shape[1] for (w, _, _) in params]
    d_max = max([in_feats] + out_dims)

    # Lane-dense padding: node axis and all feature dims to multiples of 128.
    Np = _round_up(max(N, 8), 128)
    Dp = _round_up(d_max, 128)

    # Build padded operands directly in their kernel dtypes (bf16 MXU inputs).
    a_p = jnp.zeros((Np, Np), jnp.bfloat16).at[:N, :N].set(a_hat.astype(jnp.bfloat16))
    x_p = jnp.zeros((Np, Dp), jnp.bfloat16).at[:N, :in_feats].set(
        inputs.astype(jnp.bfloat16))

    # Stacked per-layer weights [W_self ; W_neigh] -> (L, 2*Dp, Dp) bf16, biases f32.
    w_blocks, b_blocks = [], []
    for (w_self, w_neigh, bias) in params:
        din, dout = w_self.shape
        ws = jnp.zeros((Dp, Dp), jnp.float32).at[:din, :dout].set(w_self)
        wn = jnp.zeros((Dp, Dp), jnp.float32).at[:din, :dout].set(w_neigh)
        w_blocks.append(jnp.concatenate([ws, wn], axis=0))
        b_blocks.append(jnp.zeros((1, Dp), jnp.float32).at[:, :dout].set(bias))
    w_all = jnp.stack(w_blocks).astype(jnp.bfloat16)  # (L, 2*Dp, Dp)
    b_all = jnp.stack(b_blocks)                       # (L, 1, Dp) f32

    # Explicit scoped-VMEM budget: resident A + [h|agg] carry + double-buffered
    # weights/bias + double-buffered outputs, with 2x headroom; never below the usual
    # 32 MiB default, capped at 64 MiB (v7x physical VMEM).
    resident_bytes = Np * Np * 2 + Np * 2 * Dp * 2
    pipelined_bytes = 2 * (2 * Dp * Dp * 2 + Dp * 4) + 2 * 2 * Np * Dp * 4
    vmem_bytes = int(min(max(2 * (resident_bytes + pipelined_bytes), 32 << 20),
                         64 << 20))

    kernel = functools.partial(_fused_sage_kernel, num_layers=L, dp=Dp)

    logits_p, emb_p = pl.pallas_call(
        kernel,
        out_shape=(
            jax.ShapeDtypeStruct((Np, Dp), jnp.float32),
            jax.ShapeDtypeStruct((Np, Dp), jnp.float32),
        ),
        grid=(L,),
        in_specs=[
            pl.BlockSpec(memory_space=pl.ANY),               # A_hat: HBM, copied once
            pl.BlockSpec(memory_space=pl.ANY),               # features: HBM, copied once
            pl.BlockSpec((1, 2 * Dp, Dp), lambda l: (l, 0, 0)),  # per-layer weights
            pl.BlockSpec((1, 1, Dp), lambda l: (l, 0, 0)),       # per-layer bias
        ],
        out_specs=(
            pl.BlockSpec((Np, Dp), lambda l: (0, 0)),
            pl.BlockSpec((Np, Dp), lambda l: (0, 0)),
        ),
        scratch_shapes=[
            pltpu.VMEM((Np, Np), jnp.bfloat16),      # resident A_hat (single buffer)
            pltpu.VMEM((Np, 2 * Dp), jnp.bfloat16),  # [h | agg] carry across layers
        ],
        compiler_params=pltpu.CompilerParams(
            dimension_semantics=("arbitrary",),       # layers are strictly sequential
            vmem_limit_bytes=vmem_bytes,
        ),
    )(a_p, x_p, w_all, b_all)

    n_classes = params[-1][0].shape[1]
    n_hidden = params[-2][0].shape[1]
    return logits_p[:N, :n_classes], emb_p[:N, :n_hidden]


def reference_forward(a_hat, inputs, params):
    """Pure-JAX reference with matching bf16-input / f32-accumulate precision."""
    h = inputs
    emb = None
    L = len(params)
    a_bf = a_hat.astype(jnp.bfloat16)
    for l, (w_self, w_neigh, bias) in enumerate(params):
        h_bf = h.astype(jnp.bfloat16)
        agg = jnp.dot(a_bf, h_bf, preferred_element_type=jnp.float32)
        out = (
            jnp.dot(h_bf, w_self.astype(jnp.bfloat16),
                    preferred_element_type=jnp.float32)
            + jnp.dot(agg.astype(jnp.bfloat16), w_neigh.astype(jnp.bfloat16),
                      preferred_element_type=jnp.float32)
            + bias
        )
        if l != L - 1:
            out = jnp.maximum(out, 0.0)
        h = out
        if l == L - 2:
            emb = h
    return h, emb


def _init_linear(key, din, dout):
    """Deterministic Xavier-uniform-ish init; weight stored as (din, dout) = W^T."""
    limit = jnp.sqrt(6.0 / (din + dout))
    w = jax.random.uniform(key, (din, dout), jnp.float32, -limit, limit)
    b = jnp.zeros((1, dout), jnp.float32)
    return w, b


def build_params(key, in_feats, n_hidden, n_classes, n_layers):
    """Mirror GraphSAGE2.__init__: [in->h] + (n_layers-1)*[h->h] + [h->classes]."""
    dims = [in_feats] + [n_hidden] * n_layers + [n_classes]
    params = []
    for l in range(len(dims) - 1):
        key, k1, k2 = jax.random.split(key, 3)
        w_self, _ = _init_linear(k1, dims[l], dims[l + 1])
        w_neigh, bias = _init_linear(k2, dims[l], dims[l + 1])
        params.append((w_self, w_neigh, bias))
    return params


def row_normalize(adj):
    """Mean-aggregator normalization: divide each row by in-degree (0-deg rows -> 0)."""
    deg = jnp.sum(adj, axis=1, keepdims=True)
    return jnp.where(deg > 0, adj / jnp.maximum(deg, 1.0), 0.0)


if __name__ == "__main__":
    key = jax.random.PRNGKey(0)
    k_adj, k_feat, k_param = jax.random.split(key, 3)

    # Small deterministic graph: N nodes, random directed edges.
    N = 64
    in_feats, n_hidden, n_classes, n_layers = 32, 64, 16, 2  # -> 3 SAGEConv layers

    adj = jax.random.bernoulli(k_adj, p=0.1, shape=(N, N)).astype(jnp.float32)
    a_hat = row_normalize(adj)

    inputs = jax.random.normal(k_feat, (N, in_feats), jnp.float32)
    params = build_params(k_param, in_feats, n_hidden, n_classes, n_layers)

    logits, emb = graphsage2_forward(a_hat, inputs, params)
    jax.block_until_ready((logits, emb))

    assert logits.shape == (N, n_classes)
    assert emb.shape == (N, n_hidden)

    ref_logits, ref_emb = reference_forward(a_hat, inputs, params)
    assert jnp.allclose(logits, ref_logits, atol=2e-2, rtol=2e-2)
    assert jnp.allclose(emb, ref_emb, atol=2e-2, rtol=2e-2)

    print("KERNEL_OK")
</pallas_src>

<mosaic_0001>
module attributes {stable_mosaic.version = 11 : i64} {
  func.func @_fused_sage_kernel(%arg0: i32, %arg1: memref<128x128xbf16, #tpu.memory_space<any>>, %arg2: memref<128x128xbf16, #tpu.memory_space<any>>, %arg3: memref<1x256x128xbf16, #tpu.memory_space<vmem>>, %arg4: memref<1x1x128xf32, #tpu.memory_space<vmem>>, %arg5: memref<128x128xf32, #tpu.memory_space<vmem>>, %arg6: memref<128x128xf32, #tpu.memory_space<vmem>>, %arg7: memref<128x128xbf16, #tpu.memory_space<vmem>>, %arg8: memref<128x256xbf16, #tpu.memory_space<vmem>>) attributes {dimension_semantics = [#tpu.dimension_semantics<arbitrary>], iteration_bounds = array<i64: 3>, scalar_prefetch = 0 : i64, scratch_operands = 2 : i64, tpu.core_type = #tpu.core_type<tc>, window_params = [{}, {}, {transform_indices = @transform_2, window_bounds = array<i64: 1, 256, 128>}, {transform_indices = @transform_3, window_bounds = array<i64: 1, 1, 128>}, {pipeline_mode = #tpu.pipeline_mode<synchronous>, transform_indices = @transform_4, window_bounds = array<i64: 128, 128>}, {pipeline_mode = #tpu.pipeline_mode<synchronous>, transform_indices = @transform_5, window_bounds = array<i64: 128, 128>}]} {
    %c0_i32 = arith.constant 0 : i32
    %0 = arith.cmpi eq, %arg0, %c0_i32 : i32
    %1 = arith.extui %0 : i1 to i32
    %c0_i32_0 = arith.constant 0 : i32
    %2 = arith.cmpi ne, %1, %c0_i32_0 : i32
    scf.if %2 {
      "tpu.region"() ({
        %27 = tpu.sem_alloc : memref<!tpu.dma_semaphore, #tpu.memory_space<semaphore_mem>>
        tpu.enqueue_dma source(%arg1 : memref<128x128xbf16, #tpu.memory_space<any>>) target(%arg7 : memref<128x128xbf16, #tpu.memory_space<vmem>>) target_semaphore(%27 : memref<!tpu.dma_semaphore, #tpu.memory_space<semaphore_mem>>)
        tpu.wait_dma2 semaphore(%27 : memref<!tpu.dma_semaphore, #tpu.memory_space<semaphore_mem>>) src(%arg1 : memref<128x128xbf16, #tpu.memory_space<any>>) dst(%arg7 : memref<128x128xbf16, #tpu.memory_space<vmem>>)
        tpu.yield
      }) : () -> ()
      "tpu.region"() ({
        %27 = tpu.sem_alloc : memref<!tpu.dma_semaphore, #tpu.memory_space<semaphore_mem>>
        %c0_i32_19 = arith.constant 0 : i32
        %c0_i32_20 = arith.constant 0 : i32
        %28 = tpu.memref_slice %arg8[%c0_i32_19, %c0_i32_20] : memref<128x256xbf16, #tpu.memory_space<vmem>> -> memref<128x128xbf16, #tpu.memory_space<vmem>>
        tpu.enqueue_dma source(%arg2 : memref<128x128xbf16, #tpu.memory_space<any>>) target(%28 : memref<128x128xbf16, #tpu.memory_space<vmem>>) target_semaphore(%27 : memref<!tpu.dma_semaphore, #tpu.memory_space<semaphore_mem>>)
        %c0_i32_21 = arith.constant 0 : i32
        %c0_i32_22 = arith.constant 0 : i32
        %29 = tpu.memref_slice %arg8[%c0_i32_21, %c0_i32_22] : memref<128x256xbf16, #tpu.memory_space<vmem>> -> memref<128x128xbf16, #tpu.memory_space<vmem>>
        tpu.wait_dma2 semaphore(%27 : memref<!tpu.dma_semaphore, #tpu.memory_space<semaphore_mem>>) src(%arg2 : memref<128x128xbf16, #tpu.memory_space<any>>) dst(%29 : memref<128x128xbf16, #tpu.memory_space<vmem>>)
        tpu.yield
      }) : () -> ()
    } else {
    }
    %c0 = arith.constant 0 : index
    %c0_1 = arith.constant 0 : index
    %3 = vector.load %arg7[%c0, %c0_1] : memref<128x128xbf16, #tpu.memory_space<vmem>>, vector<128x128xbf16>
    %c0_2 = arith.constant 0 : index
    %c0_3 = arith.constant 0 : index
    %4 = vector.load %arg8[%c0_2, %c0_3] : memref<128x256xbf16, #tpu.memory_space<vmem>>, vector<128x128xbf16>
    %cst = arith.constant dense<0.000000e+00> : vector<128x128xf32>
    %5 = tpu.matmul %3, %4, %cst {dimension_numbers = #tpu.dot_dimension_numbers<[1], [0], [0], [1], [0, 0, 1, 1], [], []>} : vector<128x128xbf16>, vector<128x128xbf16>, vector<128x128xf32> -> vector<128x128xf32>
    %6 = arith.truncf %5 : vector<128x128xf32> to vector<128x128xbf16>
    %c0_4 = arith.constant 0 : index
    %c128 = arith.constant 128 : index
    %7 = vector.load %arg8[%c0_4, %c128] : memref<128x256xbf16, #tpu.memory_space<vmem>>, vector<128x128xbf16>
    tpu.vector_store %arg8[%c0_4, %c128], %6 {strides = array<i32>} : memref<128x256xbf16, #tpu.memory_space<vmem>>, vector<128x128xbf16>,
    %c0_5 = arith.constant 0 : index
    %c0_6 = arith.constant 0 : index
    %8 = vector.load %arg8[%c0_5, %c0_6] : memref<128x256xbf16, #tpu.memory_space<vmem>>, vector<128x256xbf16>
    %c0_7 = arith.constant 0 : index
    %c0_8 = arith.constant 0 : index
    %c0_9 = arith.constant 0 : index
    %9 = vector.load %arg3[%c0_7, %c0_8, %c0_9] : memref<1x256x128xbf16, #tpu.memory_space<vmem>>, vector<1x256x128xbf16>
    %10 = vector.shape_cast %9 : vector<1x256x128xbf16> to vector<256x128xbf16>
    %cst_10 = arith.constant dense<0.000000e+00> : vector<128x128xf32>
    %11 = tpu.matmul %8, %10, %cst_10 {dimension_numbers = #tpu.dot_dimension_numbers<[1], [0], [0], [1], [0, 0, 1, 1], [], []>} : vector<128x256xbf16>, vector<256x128xbf16>, vector<128x128xf32> -> vector<128x128xf32>
    %c0_11 = arith.constant 0 : index
    %c0_12 = arith.constant 0 : index
    %c0_13 = arith.constant 0 : index
    %12 = vector.load %arg4[%c0_11, %c0_12, %c0_13] : memref<1x1x128xf32, #tpu.memory_space<vmem>>, vector<1x1x128xf32>
    %13 = vector.shape_cast %12 : vector<1x1x128xf32> to vector<1x128xf32>
    %14 = vector.broadcast %13 : vector<1x128xf32> to vector<128x128xf32>
    %15 = arith.addf %11, %14 : vector<128x128xf32>
    %cst_14 = arith.constant 0.000000e+00 : f32
    %16 = vector.broadcast %cst_14 : f32 to vector<128x128xf32>
    %17 = arith.maximumf %15, %16 : vector<128x128xf32>
    %c2_i32 = arith.constant 2 : i32
    %18 = arith.cmpi slt, %arg0, %c2_i32 : i32
    %19 = arith.extui %18 : i1 to i32
    %c0_i32_15 = arith.constant 0 : i32
    %20 = arith.cmpi ne, %19, %c0_i32_15 : i32
    scf.if %20 {
      %27 = arith.truncf %17 : vector<128x128xf32> to vector<128x128xbf16>
      %c0_19 = arith.constant 0 : index
      %c0_20 = arith.constant 0 : index
      %28 = vector.load %arg8[%c0_19, %c0_20] : memref<128x256xbf16, #tpu.memory_space<vmem>>, vector<128x128xbf16>
      tpu.vector_store %arg8[%c0_19, %c0_20], %27 {strides = array<i32>} : memref<128x256xbf16, #tpu.memory_space<vmem>>, vector<128x128xbf16>,
    } else {
    }
    %c1_i32 = arith.constant 1 : i32
    %21 = arith.cmpi eq, %arg0, %c1_i32 : i32
    %22 = arith.extui %21 : i1 to i32
    %c0_i32_16 = arith.constant 0 : i32
    %23 = arith.cmpi ne, %22, %c0_i32_16 : i32
    scf.if %23 {
      %c0_19 = arith.constant 0 : index
      %c0_20 = arith.constant 0 : index
      %27 = vector.load %arg6[%c0_19, %c0_20] : memref<128x128xf32, #tpu.memory_space<vmem>>, vector<128x128xf32>
      tpu.vector_store %arg6[%c0_19, %c0_20], %17 {strides = array<i32>} : memref<128x128xf32, #tpu.memory_space<vmem>>, vector<128x128xf32>,
    } else {
    }
    %c2_i32_17 = arith.constant 2 : i32
    %24 = arith.cmpi eq, %arg0, %c2_i32_17 : i32
    %25 = arith.extui %24 : i1 to i32
    %c0_i32_18 = arith.constant 0 : i32
    %26 = arith.cmpi ne, %25, %c0_i32_18 : i32
    scf.if %26 {
      %c0_19 = arith.constant 0 : index
      %c0_20 = arith.constant 0 : index
      %27 = vector.load %arg5[%c0_19, %c0_20] : memref<128x128xf32, #tpu.memory_space<vmem>>, vector<128x128xf32>
      tpu.vector_store %arg5[%c0_19, %c0_20], %15 {strides = array<i32>} : memref<128x128xf32, #tpu.memory_space<vmem>>, vector<128x128xf32>,
    } else {
    }
    return
  }
  func.func @transform_2(%arg0: i32) -> (i32, i32, i32) {
    %c0_i32 = arith.constant 0 : i32
    %c0_i32_0 = arith.constant 0 : i32
    %c0_i32_1 = arith.constant 0 : i32
    return %arg0, %c0_i32, %c0_i32_0 : i32, i32, i32
  }
  func.func @transform_3(%arg0: i32) -> (i32, i32, i32) {
    %c0_i32 = arith.constant 0 : i32
    %c0_i32_0 = arith.constant 0 : i32
    %c0_i32_1 = arith.constant 0 : i32
    return %arg0, %c0_i32, %c0_i32_0 : i32, i32, i32
  }
  func.func @transform_4(%arg0: i32) -> (i32, i32) {
    %c0_i32 = arith.constant 0 : i32
    %c0_i32_0 = arith.constant 0 : i32
    %c0_i32_1 = arith.constant 0 : i32
    return %c0_i32, %c0_i32_0 : i32, i32
  }
  func.func @transform_5(%arg0: i32) -> (i32, i32) {
    %c0_i32 = arith.constant 0 : i32
    %c0_i32_0 = arith.constant 0 : i32
    %c0_i32_1 = arith.constant 0 : i32
    return %c0_i32, %c0_i32_0 : i32, i32
  }
}

</mosaic_0001>

<bundles_post_ra>
// kernel: tpu_custom_call.1
= control target key start
LH: loop header
LB: loop body
LE: loop exit
PB: predicated region body
PF: predicated region fallthrough
CT: control target
= control target key end

     0   :  { %11 = vsyncpa [#allocation5], 0  ;;  %s1577_s0 = inlined_call_operand.hbm [shape: bf16[128,128], index: 0, kind: input, shape index: {}]   ;;  %s1578_s1 = inlined_call_operand.hbm [shape: bf16[128,128], index: 1, kind: input, shape index: {}]   ;;  %s1579_s2 = inlined_call_operand.hbm [shape: bf16[3,256,128], index: 2, kind: input, shape index: {}]   ;;  %s1580_s3 = inlined_call_operand.vmem [shape: f32[3,1,128], index: 3, kind: input, shape index: {}]   ;;  %s1581_s4 = inlined_call_operand.hbm [shape: f32[128,128], index: 4, kind: output, shape index: {0}]   ;;  %s1582_s5 = inlined_call_operand.hbm [shape: f32[128,128], index: 5, kind: output, shape index: {1}]  }
   0x1   :  { %13 = vsyncpa [#allocation5 + $0x1], 0 }
   0x2   :  { %14 = vsyncpa [#allocation6], 0 }
   0x3   :  { %15 = vsyncpa [#allocation9], 0  ;;  %s1224_s18 = smov 0   ;;  %s1226_s19 = smov 0  }
   0x4   :  { %s1228_s20 = smov 0   ;;  %s1230_s21 = smov 0  }
   0x5 LB: > { %s1243_s22 = sadd.s32 4294967295, %s1180_s21   ;;  %s1246_s23 = sadd.s32 1, %s1180_s21   ;;  %s1180_s21 = sphi %s1230_s21, %s1589_s21   ;;  %s1176_s20 = sphi %s1228_s20, %s1588_s20   ;;  %s1172_s19 = sphi %s1226_s19, %s1587_s19   ;;  %s1168_s18 = sphi %s1224_s18, %s1586_s18  }
   0x6   : > { %s25_s24 = ssub.s32 %s1180_s21, %s1246_s23  ;;  %s28_s25 = sadd.s32 1, %s1176_s20 }
   0x7   : > { %p26_p0 = scmp.eq.s32.totalorder %s25_s24, 0  ;;  %p35_p1 = scmp.ne.s32.totalorder %s1176_s20, %s1172_s19 }
   0x8   : > { %p36_p2 = scmp.eq.s32.totalorder %s1180_s21, 0  ;;  %p41_p3 = scmp.ne.s32.totalorder %s1172_s19, %s1168_s18 }
   0x9   : > { %s1256_s26 = scalar_select %p26_p0, %s1176_s20, %s28_s25  }
   0xa   : > { %p37_p4 = por %p36_p2, %p35_p1  ;;  %p42_p5 = scmp.eq.s32.totalorder %s1243_s22, 0 }
   0xb   : > { %p944_p6 = scmp.lt.s32.totalorder %s1180_s21, 3  ;;  %s133_s28 = sand.u32 1, %s1176_s20  }
   0xc   : > { %p1260_p7 = por %p42_p5, %p41_p3  ;;  %s769_s29 = sshll.u32 %s133_s28, 7 }
   0xd   : > { %s801_s30 = sshll.u32 %s1180_s21, 11  ;;  %s137_s9 = scalar_lea.vmem [#allocation4], %s769_s29 }
   0xe   : > { %s1269_s8 = scalar_lea.hbm %s1579_s2, %s801_s30  ;;  %s144_s10 = sshll.u32 %s137_s9, 4  ;;  %s1271_s10 = int_to_ptr.vmem [resolvable:$true] %s144_s10 }
   0xf   : > { %p1273_p8 = pnand %p944_p6, %p37_p4  ;;  %s1278_s12 = scalar_lea.sflag [#allocation5], %s133_s28 }
  0x10   : > { %s1008_s13 = scalar_lea.hbm %s1269_s8, 2048  ;;  %s1013_s16 = scalar_lea.hbm %s1579_s2, 6144 }
  0x11   : > { %p1009_p10 = scmp.ne.s32.totalorder %s1269_s8, %s1008_s13  ;;  %p1010_p11 = pneg %p1273_p8 }
  0x12   : > { %p1014_p0 = scmp.lt.u32.totalorder %s1269_s8, %s1579_s2  ;;  %p1015_p1 = scmp.lt.u32.totalorder %s1013_s16, %s1008_s13 }
  0x13   : > { %p1011_p12 = pnand %p1010_p11, %p1009_p10  ;;  %p1017_p3 = scmp.lt.u32.totalorder %s1008_s13, %s1269_s8 }
  0x14   : > { %p1016_p2 = por %p1015_p1, %p1014_p0 }
  0x15   : > { %p1012_p13 = pneg %p1011_p12 }
  0x16   : > { %p1018_p4 = por %p1017_p3, %p1016_p2 }
  0x18   : > { %p1019_p5 = pnand %p1018_p4, %p1012_p13 }
  0x1a   : > { %1022 = shalt.err (!%p1019_p5)
}
  0x1b   : > { %s1023_s24 = scalar_lea.vmem %s1271_s10, 2048  ;;  %s1182_s25 = smov [#allocation4]  }
  0x1c   : > { %p1024_p6 = scmp.ne.s32.totalorder %s1271_s10, %s1023_s24  ;;  %s1028_s28 = sshll.u32 %s1182_s25, 4  ;;  %s1029_s28 = int_to_ptr.vmem [resolvable:$false] %s1028_s28 }
  0x1d   : > { %s1030_s29 = scalar_lea.vmem %s1029_s28, 4096  ;;  %p1031_p9 = scmp.lt.s32.totalorder %s1271_s10, %s1029_s28 }
  0x1e   : > { %p1026_p10 = pnand %p1024_p6, %p1010_p11  ;;  %p1032_p0 = scmp.lt.s32.totalorder %s1030_s29, %s1023_s24 }
  0x20   : > { %p1027_p12 = pneg %p1026_p10  ;;  %p1033_p1 = por %p1032_p0, %p1031_p9 }
  0x22   : > { %p1034_p2 = pnand %p1033_p1, %p1027_p12 }
  0x24   : > { %1037 = shalt.err (!%p1034_p2)
}
  0x25   : > { %s1183_s30 = smov 64   ;;  %s1184_s6 = smov 4  }
  0x26   : > { %943 = dma.hbm_to_vmem [thread:$0]  (!%p1273_p8), %s1269_s8, 2048, %s1271_s10, %s1278_s12, %s1183_s30, %s1183_s30, %s1184_s6  }
  0x27   : > { %p158_p11 = scmp.lt.s32.totalorder %s1180_s21, 4  ;;  %p1585_p13 = scmp.ge.s32.totalorder %s1180_s21, 1 }
  0x29   : > { %p159_p3 = pnand %p1585_p13, %p158_p11 }
  0x2a   : > { %s164_s7 = sand.u32 (!%p159_p3), 1, %s1172_s19  }
  0x2b   : > { %162 = sbr.rel (%p159_p3) target bundleno = 692 (0x2b4), region = 28  ;;  %s773_s9 = sshll.u32 (!%p159_p3), %s164_s7, 7 }
  0x2c   : > { %s165_s13 = scalar_lea.sflag (!%p159_p3), [#allocation5], %s164_s7  ;;  %s1310_s14 = scalar_lea.vmem (!%p159_p3), [#allocation4], %s773_s9 }
  0x32   : > { %1151 = dma.done.wait (%p1260_p7), %s165_s13, 2048  }
  0x33   : > { %1153 = vsyncadd (%p1260_p7), %s165_s13, 4294965248  ;;  %p189_p9 = scmp.lt.s32.totalorder %s1243_s22, 2  ;;  %p774_p8 = scmp.ne.s32.totalorder %s1243_s22, 0 }
  0x35   : > { %s1318_s8 = scalar_select %p189_p9, %s1243_s22, 2 }
  0x36   : > { %196 = sbr.rel (%p774_p8) target bundleno = 100 (0x64), region = 36 }
  0x37   : > { %s191_s11 = scalar_lea.vmem %s1580_s3, %s1318_s8 }
  0x3d   : > { %s1185_s12 = smov [#allocation2]   ;;  %s1038_s27 = scalar_lea.hbm %s1577_s0, 1024 }
  0x3e   : > { %s204_s15 = sshll.u32 %s1185_s12, 4  ;;  %p1039_p7 = scmp.ne.s32.totalorder %s1577_s0, %s1038_s27  ;;  %s205_s15 = int_to_ptr.vmem [resolvable:$true] %s204_s15 }
  0x3f   : > { %p1042_p4 = scmp.lt.u32.totalorder %s1038_s27, %s1577_s0 }
  0x41   : > { %p1044_p5 = pnand %p1042_p4, %p1039_p7 }
  0x43   : > { %1047 = shalt.err (!%p1044_p5)  }
  0x44   : > { %s1048_s29 = scalar_lea.vmem %s205_s15, 1024  ;;  %p1053_p10 = scmp.lt.s32.totalorder %s205_s15, %s205_s15 }
  0x45   : > { %p1049_p6 = scmp.ne.s32.totalorder %s205_s15, %s1048_s29  ;;  %p1054_p12 = scmp.lt.s32.totalorder %s1048_s29, %s1048_s29 }
  0x47   : > { %p1055_p0 = por %p1054_p12, %p1053_p10 }
  0x49   : > { %p1056_p1 = pnand %p1055_p0, %p1049_p6 }
  0x4b   : > { %1059 = shalt.err (!%p1056_p1)  }
  0x4c   : > { %207 = dma.hbm_to_vmem [thread:$0]  %s1577_s0, 1024, %s205_s15, [#allocation10] }
  0x4d   : > { %1154 = dma.done.wait [#allocation10], 1024 }
  0x4e   : > { %1155 = vsyncadd [#allocation10], 4294966272 }
  0x4f   : > { %s1186_s7 = smov [#allocation3]   ;;  %s1060_s10 = scalar_lea.hbm %s1578_s1, 1024 }
  0x50   : > { %s213_s9 = sshll.u32 %s1186_s7, 4  ;;  %p1061_p2 = scmp.ne.s32.totalorder %s1578_s1, %s1060_s10  ;;  %s214_s9 = int_to_ptr.vmem [resolvable:$true] %s213_s9 }
  0x51   : > { %p1064_p11 = scmp.lt.u32.totalorder %s1060_s10, %s1578_s1 }
  0x53   : > { %p1066_p13 = pnand %p1064_p11, %p1061_p2 }
  0x55   : > { %1069 = shalt.err (!%p1066_p13)  }
  0x56   : > { %s1070_s15 = scalar_lea.vmem %s214_s9, 1024  ;;  %s1074_s18 = scalar_lea.vmem %s214_s9, 2048 }
  0x57   : > { %p1071_p3 = scmp.ne.s32.totalorder %s214_s9, %s1070_s15  ;;  %p1075_p9 = scmp.lt.s32.totalorder %s214_s9, %s214_s9 }
  0x58   : > { %p1076_p8 = scmp.lt.s32.totalorder %s1074_s18, %s1070_s15 }
  0x5a   : > { %p1077_p7 = por %p1076_p8, %p1075_p9 }
  0x5c   : > { %p1078_p4 = pnand %p1077_p7, %p1071_p3 }
  0x5e   : > { %1081 = shalt.err (!%p1078_p4)  }
  0x5f   : > { %s1187_s24 = smov 128   ;;  %s1188_s25 = smov 256  }
  0x60   : > { %s1189_s28 = smov 8  }
  0x61   : > { %216 = dma.hbm_to_vmem [thread:$0]  %s1578_s1, 1024, %s214_s9, [#allocation15], %s1187_s24, %s1188_s25, %s1189_s28 }
  0x62   : > { %1156 = dma.done.wait [#allocation15], 1024 }
  0x63   : > { %1157 = vsyncadd [#allocation15], 4294966272 }
  0x64 PF: > { %v1349_v0 = vld [vmem:[#allocation3] sm:$0xff]  ;;  %v1351_v1 = vld [vmem:[#allocation3 + $0x10] sm:$0xff]  ;;  %v994_v7 = vld [vmem:[%s1310_s14 + $0x48] sm:$0xff]   ;;  %p792_p5 = scmp.ge.s32.totalorder %s1243_s22, 2 }
  0x65   : > { %882 = vmatprep.subr.bf16.mxu0 %v1349_v0  ;;  %v221_v2 = vld [vmem:[#allocation2] sm:$0xff]  ;;  %v1359_v4 = vld [vmem:[#allocation3 + $0x30] sm:$0xff]  ;;  %v995_v9 = vld [vmem:[%s1310_s14 + $0x8] sm:$0xff]  }
  0x66   : > { %883 = vmatpush3.bf16.msra.mxu0 %v1349_v0  ;;  %898 = vmatprep.mubr.bf16.mxu0 %v221_v2  ;;  %v1356_v3 = vld [vmem:[#allocation3 + $0x20] sm:$0xff]  ;;  %v996_v10 = vld [vmem:[%s1310_s14 + $0x50] sm:$0xff]   ;;  %v998_v13 = vld [vmem:[%s1310_s14 + $0x58] sm:$0xff]  }
  0x67   : > { %884 = vmatprep.subr.bf16.mxu0 %v1351_v1  ;;  %v992_v5 = vld [vmem:[%s1310_s14 + $0x40] sm:$0xff]   ;;  %v997_v11 = vld [vmem:[%s1310_s14 + $0x10] sm:$0xff]   ;;  %v999_v14 = vld [vmem:[%s1310_s14 + $0x18] sm:$0xff]  }
  0x68   : > { %v993_v6 = vld [vmem:[%s1310_s14] sm:$0xff]   ;;  %914 = vmatprep.subr.bf16.mxu1 %v992_v5  ;;  %v1373_v12 = vld [vmem:[#allocation3 + $0x50] sm:$0xff]  ;;  %v222_v18 = vld [vmem:[#allocation2 + $0x8] sm:$0xff] }
  0x69   : > { %922 = vmatpush3.bf16.msra.mxu1 %v993_v6  ;;  %v1366_v8 = vld [vmem:[#allocation3 + $0x40] sm:$0xff]  ;;  %v1385_v17 = vld [vmem:[#allocation3 + $0x70] sm:$0xff]  ;;  %v224_v20 = vld [vmem:[#allocation2 + $0x18] sm:$0xff] }
  0x6a   : > { %885 = vmatpush3.bf16.msra.mxu0 %v1351_v1  ;;  %915 = vmatprep.subr.bf16.mxu1 %v994_v7  ;;  %v1380_v15 = vld [vmem:[#allocation3 + $0x60] sm:$0xff]  ;;  %v223_v19 = vld [vmem:[#allocation2 + $0x10] sm:$0xff]  ;;  %v226_v22 = vld [vmem:[#allocation2 + $0x28] sm:$0xff] }
  0x6b   : > { %886 = vmatprep.subr.bf16.mxu0 %v1356_v3  ;;  %v1000_v16 = vld [vmem:[%s1310_s14 + $0x60] sm:$0xff]   ;;  %v227_v23 = vld [vmem:[#allocation2 + $0x30] sm:$0xff]  ;;  %v228_v24 = vld [vmem:[#allocation2 + $0x38] sm:$0xff] }
  0x6c   : > { %v225_v21 = vld [vmem:[#allocation2 + $0x20] sm:$0xff]  ;;  %v1002_v26 = vld [vmem:[%s1310_s14 + $0x68] sm:$0xff]   ;;  %v1004_v28 = vld [vmem:[%s1310_s14 + $0x70] sm:$0xff]  }
  0x6d   : > { %923 = vmatpush3.bf16.msra.mxu1 %v995_v9  ;;  %v1001_v25 = vld [vmem:[%s1310_s14 + $0x20] sm:$0xff]   ;;  %v1003_v27 = vld [vmem:[%s1310_s14 + $0x28] sm:$0xff]   ;;  %v1005_v29 = vld [vmem:[%s1310_s14 + $0x30] sm:$0xff]  }
  0x6e   : > { %887 = vmatpush3.bf16.msra.mxu0 %v1356_v3  ;;  %916 = vmatprep.subr.bf16.mxu1 %v996_v10  ;;  %v1006_v30 = vld [vmem:[%s1310_s14 + $0x78] sm:$0xff]   ;;  %v1410_v60 = vld [vmem:[%s191_s11] ss:$0 sm:$0xff] }
  0x6f   : > { %888 = vmatprep.subr.bf16.mxu0 %v1359_v4  ;;  %v1007_v31 = vld [vmem:[%s1310_s14 + $0x38] sm:$0xff]  }
  0x71   : > { %924 = vmatpush3.bf16.msra.mxu1 %v997_v11 }
  0x72   : > { %889 = vmatpush3.bf16.msra.mxu0 %v1359_v4  ;;  %917 = vmatprep.subr.bf16.mxu1 %v998_v13 }
  0x73   : > { %890 = vmatprep.subr.bf16.mxu0 %v1366_v8 }
  0x75   : > { %925 = vmatpush3.bf16.msra.mxu1 %v999_v14 }
  0x76   : > { %891 = vmatpush3.bf16.msra.mxu0 %v1366_v8  ;;  %918 = vmatprep.subr.bf16.mxu1 %v1000_v16 }
  0x77   : > { %892 = vmatprep.subr.bf16.mxu0 %v1373_v12 }
  0x79   : > { %926 = vmatpush3.bf16.msra.mxu1 %v1001_v25 }
  0x7a   : > { %893 = vmatpush3.bf16.msra.mxu0 %v1373_v12  ;;  %919 = vmatprep.subr.bf16.mxu1 %v1002_v26 }
  0x7b   : > { %894 = vmatprep.subr.bf16.mxu0 %v1380_v15 }
  0x7d   : > { %927 = vmatpush3.bf16.msra.mxu1 %v1003_v27 }
  0x7e   : > { %895 = vmatpush3.bf16.msra.mxu0 %v1380_v15  ;;  %920 = vmatprep.subr.bf16.mxu1 %v1004_v28 }
  0x7f   : > { %896 = vmatprep.subr.bf16.mxu0 %v1385_v17 }
  0x81   : > { %928 = vmatpush3.bf16.msra.mxu1 %v1005_v29 }
  0x82   : > { %897 = vmatpush3.bf16.msra.mxu0 %v1385_v17  ;;  %921 = vmatprep.subr.bf16.mxu1 %v1006_v30 }
  0x83   : > { %818 = vmatprep.subr.bf16.mxu0 %v992_v5 }
  0x85   : > { %899 = vmatmul.mubr.bf16.vlgmr.msra.gmra.mrb[0].mxu0 %v222_v18  ;;  %929 = vmatpush3.bf16.msra.mxu1 %v1007_v31 }
  0x86   : > { %902 = vmatprep.mubr.bf16.mxu0 %v223_v19  ;;  %819 = vmatpush3.bf16.msra.mxu0 %v993_v6 }
  0x87   : > { %820 = vmatprep.subr.bf16.mxu0 %v994_v7 }
  0x8a   : > { %821 = vmatpush3.bf16.msra.mxu0 %v995_v9 }
  0x8b   : > { %822 = vmatprep.subr.bf16.mxu0 %v996_v10 }
  0x8d   : > { %903 = vmatmul.mubr.bf16.gmra.mrb[4].mxu0 %v224_v20 }
  0x8e   : > { %906 = vmatprep.mubr.bf16.mxu0 %v225_v21  ;;  %823 = vmatpush3.bf16.msra.mxu0 %v997_v11 }
  0x8f   : > { %824 = vmatprep.subr.bf16.mxu0 %v998_v13 }
  0x92   : > { %825 = vmatpush3.bf16.msra.mxu0 %v999_v14 }
  0x93   : > { %826 = vmatprep.subr.bf16.mxu0 %v1000_v16 }
  0x95   : > { %907 = vmatmul.mubr.bf16.gmra.mrb[8].mxu0 %v226_v22 }
  0x96   : > { %910 = vmatprep.mubr.bf16.mxu0 %v227_v23  ;;  %827 = vmatpush3.bf16.msra.mxu0 %v1001_v25 }
  0x97   : > { %828 = vmatprep.subr.bf16.mxu0 %v1002_v26 }
  0x9a   : > { %829 = vmatpush3.bf16.msra.mxu0 %v1003_v27 }
  0x9b   : > { %830 = vmatprep.subr.bf16.mxu0 %v1004_v28 }
  0x9d   : > { %911 = vmatmul.mubr.bf16.gmra.mrb[12].mxu0 %v228_v24 }
  0x9e   : > { %831 = vmatpush3.bf16.msra.mxu0 %v1005_v29 }
  0x9f   : > { %832 = vmatprep.subr.bf16.mxu0 %v1006_v30 }
  0xa2   : > { %833 = vmatpush3.bf16.msra.mxu0 %v1007_v31 }
 0x158   : > { %v900_v32 = vpop.f32.mrb[0].mxu0 }
 0x159   : > { %v271_v33 = vpop.f32.mrb[1].mxu0 }
 0x15a   : > { %v901_v34 = vpop.f32.mrb[2].mxu0 }
 0x15b   : > { %v335_v35 = vpack.c.bf16 %v901_v34, %v900_v32  ;;  %v274_v36 = vpop.f32.mrb[3].mxu0 }
 0x15c   : > { %v334_v37 = vpack.c.bf16 %v274_v36, %v271_v33 }
 0x15e   : > { %533 = vmatprep.mubr.bf16.mxu0 %v334_v37 }
 0x15f   : > { %534 = vmatmul.mubr.bf16.vlgmr.msra.gmra.mrb[16].mxu0 %v1349_v0 }
 0x160   : > { %v904_v38 = vpop.f32.mrb[4].mxu0  ;;  %541 = vmatprep.mubr.bf16.mxu0 %v335_v35 }
 0x161   : > { %v287_v39 = vpop.f32.mrb[5].mxu0 }
 0x162   : > { %v905_v40 = vpop.f32.mrb[6].mxu0 }
 0x163   : > { %v337_v41 = vpack.c.bf16 %v905_v40, %v904_v38  ;;  %v290_v42 = vpop.f32.mrb[7].mxu0 }
 0x164   : > { %v336_v43 = vpack.c.bf16 %v290_v42, %v287_v39 }
 0x166   : > { %549 = vmatprep.mubr.bf16.mxu1 %v336_v43 }
 0x167   : > { %550 = vmatmul.mubr.bf16.vlgmr.msra.gmra.mrb[0].mxu1 %v1356_v3  ;;  %542 = vmatmul.mubr.bf16.gmra.mrb[20].mxu0 %v1351_v1 }
 0x168   : > { %v908_v44 = vpop.f32.mrb[8].mxu0  ;;  %557 = vmatprep.mubr.bf16.mxu1 %v337_v41 }
 0x169   : > { %v303_v45 = vpop.f32.mrb[9].mxu0 }
 0x16a   : > { %v909_v46 = vpop.f32.mrb[10].mxu0 }
 0x16b   : > { %v339_v47 = vpack.c.bf16 %v909_v46, %v908_v44  ;;  %v306_v48 = vpop.f32.mrb[11].mxu0 }
 0x16c   : > { %v338_v49 = vpack.c.bf16 %v306_v48, %v303_v45 }
 0x16f   : > { %558 = vmatmul.mubr.bf16.gmra.mrb[4].mxu1 %v1359_v4 }
 0x170   : > { %565 = vmatprep.mubr.bf16.mxu1 %v338_v49  ;;  %v912_v50 = vpop.f32.mrb[12].mxu0 }
 0x171   : > { %v319_v51 = vpop.f32.mrb[13].mxu0 }
 0x172   : > { %v913_v52 = vpop.f32.mrb[14].mxu0 }
 0x173   : > { %v341_v53 = vpack.c.bf16 %v913_v52, %v912_v50  ;;  %v322_v54 = vpop.f32.mrb[15].mxu0 }
 0x174   : > { %v340_v55 = vpack.c.bf16 %v322_v54, %v319_v51 }
 0x177   : > { %566 = vmatmul.mubr.bf16.gmra.mrb[8].mxu1 %v1366_v8 }
 0x178   : > { %573 = vmatprep.mubr.bf16.mxu1 %v339_v47 }
 0x17f   : > { %574 = vmatmul.mubr.bf16.gmra.mrb[12].mxu1 %v1373_v12 }
 0x180   : > { %581 = vmatprep.mubr.bf16.mxu1 %v340_v55 }
 0x187   : > { %582 = vmatmul.mubr.bf16.gmra.mrb[16].mxu1 %v1380_v15 }
 0x188   : > { %589 = vmatprep.mubr.bf16.mxu1 %v341_v53 }
 0x18f   : > { %590 = vmatmul.mubr.bf16.gmra.mrb[20].mxu1 %v1385_v17 }
 0x232   : > { %v834_v56 = vpop.f32.mrb[16].mxu0 }
 0x233   : > { %v835_v57 = vpop.f32.mrb[17].mxu0 }
 0x234   : > { %v836_v58 = vadd.f32 %v835_v57, %v834_v56  ;;  %v837_v59 = vpop.f32.mrb[18].mxu0 }
 0x235   : > { %v838_v61 = vpop.f32.mrb[19].mxu0 }
 0x236   : > { %v1413_v62 = vadd.f32 %v836_v58, %v1410_v60  ;;  %v839_v63 = vadd.f32 %v838_v61, %v837_v59 }
 0x238   : > { %v598_v0 = vmax.f32 %v1413_v62, 0.0  ;;  %v1417_v1 = vadd.f32 %v839_v63, %v1410_v60 }
 0x23a   : > { %v846_v2 = vpop.f32.mrb[0].mxu1  ;;  %v599_v3 = vmax.f32 %v1417_v1, 0.0  ;;  %v840_v4 = vpop.f32.mrb[20].mxu0 }
 0x23b   : > { %v847_v5 = vpop.f32.mrb[1].mxu1  ;;  %v841_v6 = vpop.f32.mrb[21].mxu0 }
 0x23c   : > { %v848_v7 = vadd.f32 %v847_v5, %v846_v2  ;;  %v849_v8 = vpop.f32.mrb[2].mxu1  ;;  %v842_v9 = vadd.f32 %v841_v6, %v840_v4  ;;  %v843_v10 = vpop.f32.mrb[22].mxu0 }
 0x23d   : > { %v850_v11 = vpop.f32.mrb[3].mxu1  ;;  %v844_v12 = vpop.f32.mrb[23].mxu0 }
 0x23e   : > { %v1421_v13 = vadd.f32 %v848_v7, %v1410_v60  ;;  %v851_v14 = vadd.f32 %v850_v11, %v849_v8  ;;  %v1424_v15 = vadd.f32 %v842_v9, %v1410_v60  ;;  %v845_v16 = vadd.f32 %v844_v12, %v843_v10 }
 0x240   : > { %v602_v17 = vmax.f32 %v1421_v13, 0.0  ;;  %v1428_v18 = vadd.f32 %v851_v14, %v1410_v60  ;;  %v600_v19 = vmax.f32 %v1424_v15, 0.0  ;;  %v1432_v20 = vadd.f32 %v845_v16, %v1410_v60 }
 0x241   : > { %v618_v16 = vpack.c.bf16 (!%p792_p5), %v599_v3, %v598_v0 }
 0x242   : > { %v603_v21 = vmax.f32 %v1428_v18, 0.0  ;;  %v852_v22 = vpop.f32.mrb[4].mxu1  ;;  %v601_v23 = vmax.f32 %v1432_v20, 0.0 }
 0x243   : > { %v853_v24 = vpop.f32.mrb[5].mxu1  ;;  %626 = vst [vmem:[#allocation3] sm:$0xff] (!%p792_p5), %v618_v16 }
 0x244   : > { %v854_v25 = vadd.f32 %v853_v24, %v852_v22  ;;  %v855_v26 = vpop.f32.mrb[6].mxu1  ;;  %v619_v22 = vpack.c.bf16 (!%p792_p5), %v601_v23, %v600_v19  ;;  %v620_v24 = vpack.c.bf16 (!%p792_p5), %v603_v21, %v602_v17 }
 0x245   : > { %v856_v27 = vpop.f32.mrb[7].mxu1 }
 0x246   : > { %v1437_v28 = vadd.f32 %v854_v25, %v1410_v60  ;;  %v857_v29 = vadd.f32 %v856_v27, %v855_v26  ;;  %627 = vst [vmem:[#allocation3 + $0x10] sm:$0xff] (!%p792_p5), %v619_v22  ;;  %628 = vst [vmem:[#allocation3 + $0x20] sm:$0xff] (!%p792_p5), %v620_v24 }
 0x248   : > { %v604_v30 = vmax.f32 %v1437_v28, 0.0  ;;  %v1441_v31 = vadd.f32 %v857_v29, %v1410_v60 }
 0x24a   : > { %v605_v32 = vmax.f32 %v1441_v31, 0.0  ;;  %v858_v33 = vpop.f32.mrb[8].mxu1 }
 0x24b   : > { %v859_v34 = vpop.f32.mrb[9].mxu1 }
 0x24c   : > { %v860_v35 = vadd.f32 %v859_v34, %v858_v33  ;;  %v861_v36 = vpop.f32.mrb[10].mxu1 }
 0x24d   : > { %v862_v37 = vpop.f32.mrb[11].mxu1 }
 0x24e   : > { %v1445_v38 = vadd.f32 %v860_v35, %v1410_v60  ;;  %v863_v39 = vadd.f32 %v862_v37, %v861_v36 }
 0x250   : > { %v606_v40 = vmax.f32 %v1445_v38, 0.0  ;;  %v1449_v41 = vadd.f32 %v863_v39, %v1410_v60 }
 0x252   : > { %v607_v42 = vmax.f32 %v1449_v41, 0.0  ;;  %v864_v43 = vpop.f32.mrb[12].mxu1 }
 0x253   : > { %v865_v44 = vpop.f32.mrb[13].mxu1 }
 0x254   : > { %v866_v45 = vadd.f32 %v865_v44, %v864_v43  ;;  %v867_v46 = vpop.f32.mrb[14].mxu1  ;;  %v622_v25 = vpack.c.bf16 (!%p792_p5), %v607_v42, %v606_v40 }
 0x255   : > { %v868_v47 = vpop.f32.mrb[15].mxu1 }
 0x256   : > { %v1453_v48 = vadd.f32 %v866_v45, %v1410_v60  ;;  %v869_v49 = vadd.f32 %v868_v47, %v867_v46  ;;  %630 = vst [vmem:[#allocation3 + $0x40] sm:$0xff] (!%p792_p5), %v622_v25 }
 0x258   : > { %v608_v50 = vmax.f32 %v1453_v48, 0.0  ;;  %v1457_v51 = vadd.f32 %v869_v49, %v1410_v60 }
 0x25a   : > { %v609_v52 = vmax.f32 %v1457_v51, 0.0  ;;  %v870_v53 = vpop.f32.mrb[16].mxu1 }
 0x25b   : > { %v871_v54 = vpop.f32.mrb[17].mxu1 }
 0x25c   : > { %v872_v55 = vadd.f32 %v871_v54, %v870_v53  ;;  %v873_v56 = vpop.f32.mrb[18].mxu1  ;;  %v623_v26 = vpack.c.bf16 (!%p792_p5), %v609_v52, %v608_v50 }
 0x25d   : > { %v874_v57 = vpop.f32.mrb[19].mxu1 }
 0x25e   : > { %v1461_v58 = vadd.f32 %v872_v55, %v1410_v60  ;;  %v875_v59 = vadd.f32 %v874_v57, %v873_v56  ;;  %631 = vst [vmem:[#allocation3 + $0x50] sm:$0xff] (!%p792_p5), %v623_v26 }
 0x260   : > { %v610_v61 = vmax.f32 %v1461_v58, 0.0  ;;  %v1465_v63 = vadd.f32 %v875_v59, %v1410_v60 }
 0x262   : > { %v611_v2 = vmax.f32 %v1465_v63, 0.0  ;;  %v876_v4 = vpop.f32.mrb[20].mxu1 }
 0x263   : > { %v877_v5 = vpop.f32.mrb[21].mxu1 }
 0x264   : > { %v878_v6 = vadd.f32 %v877_v5, %v876_v4  ;;  %v879_v7 = vpop.f32.mrb[22].mxu1  ;;  %617 = sbr.rel (%p792_p5) target bundleno = 623 (0x26f), region = 46  ;;  %v624_v27 = vpack.c.bf16 (!%p792_p5), %v611_v2, %v610_v61 }
 0x265   : > { %v880_v8 = vpop.f32.mrb[23].mxu1 }
 0x266   : > { %v592_v9 = vadd.f32 %v878_v6, %v1410_v60  ;;  %v881_v10 = vadd.f32 %v880_v8, %v879_v7  ;;  %632 = vst [vmem:[#allocation3 + $0x60] sm:$0xff] (!%p792_p5), %v624_v27 }
 0x268   : > { %v612_v11 = vmax.f32 %v592_v9, 0.0  ;;  %v595_v12 = vadd.f32 %v881_v10, %v1410_v60  ;;  %v621_v60 = vpack.c.bf16 (!%p792_p5), %v605_v32, %v604_v30 }
 0x26a   : > { %v613_v14 = vmax.f32 %v595_v12, 0.0  ;;  %629 = vst [vmem:[#allocation3 + $0x30] sm:$0xff] (!%p792_p5), %v621_v60 }
 0x26c   : > { %v625_v29 = vpack.c.bf16 %v613_v14, %v612_v11 }
 0x26e   : > { %633 = vst [vmem:[#allocation3 + $0x70] sm:$0xff] %v625_v29 }
 0x26f PF: > { %p793_p6 = scmp.ne.s32.totalorder %s1243_s22, 1 }
 0x270   : > { %638 = vst [vmem:[#allocation8] sm:$0xff] (!%p793_p6), %v598_v0  ;;  %639 = vst [vmem:[#allocation8 + $0x8] sm:$0xff] (!%p793_p6), %v599_v3 }
 0x271   : > { %637 = sbr.rel (%p793_p6) target bundleno = 632 (0x278), region = 50  ;;  %640 = vst [vmem:[#allocation8 + $0x10] sm:$0xff] (!%p793_p6), %v600_v19  ;;  %641 = vst [vmem:[#allocation8 + $0x18] sm:$0xff] (!%p793_p6), %v601_v23 }
 0x272   : > { %642 = vst [vmem:[#allocation8 + $0x20] sm:$0xff] (!%p793_p6), %v602_v17  ;;  %643 = vst [vmem:[#allocation8 + $0x28] sm:$0xff] (!%p793_p6), %v603_v21 }
 0x273   : > { %644 = vst [vmem:[#allocation8 + $0x30] sm:$0xff] (!%p793_p6), %v604_v30  ;;  %645 = vst [vmem:[#allocation8 + $0x38] sm:$0xff] (!%p793_p6), %v605_v32 }
 0x274   : > { %646 = vst [vmem:[#allocation8 + $0x40] sm:$0xff] (!%p793_p6), %v606_v40  ;;  %647 = vst [vmem:[#allocation8 + $0x48] sm:$0xff] (!%p793_p6), %v607_v42 }
 0x275   : > { %648 = vst [vmem:[#allocation8 + $0x50] sm:$0xff] (!%p793_p6), %v608_v50  ;;  %649 = vst [vmem:[#allocation8 + $0x58] sm:$0xff] (!%p793_p6), %v609_v52 }
 0x276   : > { %650 = vst [vmem:[#allocation8 + $0x60] sm:$0xff] (!%p793_p6), %v610_v61  ;;  %651 = vst [vmem:[#allocation8 + $0x68] sm:$0xff] (!%p793_p6), %v611_v2 }
 0x277   : > { %652 = vst [vmem:[#allocation8 + $0x70] sm:$0xff] (!%p793_p6), %v612_v11  ;;  %653 = vst [vmem:[#allocation8 + $0x78] sm:$0xff] (!%p793_p6), %v613_v14 }
 0x278 PF: > { %p794_p10 = scmp.ne.s32.totalorder %s1243_s22, 2 }
 0x279   : > { %658 = vst [vmem:[#allocation7] sm:$0xff] (!%p794_p10), %v1413_v62  ;;  %659 = vst [vmem:[#allocation7 + $0x8] sm:$0xff] (!%p794_p10), %v1417_v1 }
 0x27a   : > { %657 = sbr.rel (%p794_p10) target bundleno = 641 (0x281), region = 54  ;;  %660 = vst [vmem:[#allocation7 + $0x10] sm:$0xff] (!%p794_p10), %v1424_v15  ;;  %661 = vst [vmem:[#allocation7 + $0x18] sm:$0xff] (!%p794_p10), %v1432_v20 }
 0x27b   : > { %662 = vst [vmem:[#allocation7 + $0x20] sm:$0xff] (!%p794_p10), %v1421_v13  ;;  %663 = vst [vmem:[#allocation7 + $0x28] sm:$0xff] (!%p794_p10), %v1428_v18 }
 0x27c   : > { %664 = vst [vmem:[#allocation7 + $0x30] sm:$0xff] (!%p794_p10), %v1437_v28  ;;  %665 = vst [vmem:[#allocation7 + $0x38] sm:$0xff] (!%p794_p10), %v1441_v31 }
 0x27d   : > { %666 = vst [vmem:[#allocation7 + $0x40] sm:$0xff] (!%p794_p10), %v1445_v38  ;;  %667 = vst [vmem:[#allocation7 + $0x48] sm:$0xff] (!%p794_p10), %v1449_v41 }
 0x27e   : > { %668 = vst [vmem:[#allocation7 + $0x50] sm:$0xff] (!%p794_p10), %v1453_v48  ;;  %669 = vst [vmem:[#allocation7 + $0x58] sm:$0xff] (!%p794_p10), %v1457_v51 }
 0x27f   : > { %670 = vst [vmem:[#allocation7 + $0x60] sm:$0xff] (!%p794_p10), %v1461_v58  ;;  %671 = vst [vmem:[#allocation7 + $0x68] sm:$0xff] (!%p794_p10), %v1465_v63 }
 0x280   : > { %672 = vst [vmem:[#allocation7 + $0x70] sm:$0xff] (!%p794_p10), %v592_v9  ;;  %673 = vst [vmem:[#allocation7 + $0x78] sm:$0xff] (!%p794_p10), %v595_v12 }
 0x281 PF: > { %p945_p12 = scmp.eq.s32.totalorder %s1243_s22, 2  ;;  %s1190_s8 = smov [#allocation7]  }
 0x282   : > { %s680_s11 = sshll.u32 %s1190_s8, 4  ;;  %s681_s11 = int_to_ptr.vmem [resolvable:$true] %s680_s11 }
 0x283   : > { %s1082_s7 = scalar_lea.vmem %s681_s11, 2048  ;;  %p1089_p11 = scmp.lt.s32.totalorder %s681_s11, %s681_s11 }
 0x284   : > { %p1083_p0 = scmp.ne.s32.totalorder %s681_s11, %s1082_s7  ;;  %p1090_p13 = scmp.lt.s32.totalorder %s1082_s7, %s1082_s7 }
 0x286   : > { %p1084_p1 = pnand %p1083_p0, %p945_p12  ;;  %p1091_p3 = por %p1090_p13, %p1089_p11 }
 0x288   : > { %p1085_p2 = pneg %p1084_p1 }
 0x28a   : > { %p1092_p9 = pnand %p1091_p3, %p1085_p2 }
 0x28c   : > { %1095 = shalt.err (!%p1092_p9)
}
 0x28d   : > { %s1096_s21 = scalar_lea.hbm %s1581_s4, 2048 }
 0x28e   : > { %p1097_p8 = scmp.ne.s32.totalorder %s1581_s4, %s1096_s21  ;;  %p1102_p5 = scmp.lt.u32.totalorder %s1096_s21, %s1581_s4 }
 0x290   : > { %p1098_p7 = pnand %p1097_p8, %p945_p12 }
 0x292   : > { %p1099_p4 = pneg %p1098_p7 }
 0x294   : > { %p1104_p6 = pnand %p1102_p5, %p1099_p4 }
 0x296   : > { %1107 = shalt.err (!%p1104_p6)
}
 0x297   : > { %s1191_s27 = smov 128   ;;  %s1192_s15 = smov 8  }
 0x298   : > { %933 = dma.vmem_to_hbm [thread:$0]  (%p945_p12), %s681_s11, 2048, %s1581_s4, [#allocation6], %s1191_s27, %s1191_s27, %s1192_s15  }
 0x299   : > { %s1193_s25 = smov [#allocation8]  }
 0x29a   : > { %s693_s28 = sshll.u32 %s1193_s25, 4  ;;  %s694_s28 = int_to_ptr.vmem [resolvable:$true] %s693_s28 }
 0x29b   : > { %s1108_s29 = scalar_lea.vmem %s694_s28, 2048  ;;  %p1115_p2 = scmp.lt.s32.totalorder %s694_s28, %s694_s28 }
 0x29c   : > { %p1109_p10 = scmp.ne.s32.totalorder %s694_s28, %s1108_s29  ;;  %p1116_p11 = scmp.lt.s32.totalorder %s1108_s29, %s1108_s29 }
 0x29e   : > { %p1110_p0 = pnand %p1109_p10, %p945_p12  ;;  %p1117_p13 = por %p1116_p11, %p1115_p2 }
 0x2a0   : > { %p1111_p1 = pneg %p1110_p0 }
 0x2a2   : > { %p1118_p3 = pnand %p1117_p13, %p1111_p1 }
 0x2a4   : > { %1121 = shalt.err (!%p1118_p3)
}
 0x2a5   : > { %s1122_s6 = scalar_lea.hbm %s1582_s5, 2048 }
 0x2a6   : > { %p1123_p9 = scmp.ne.s32.totalorder %s1582_s5, %s1122_s6  ;;  %p1128_p4 = scmp.lt.u32.totalorder %s1122_s6, %s1582_s5 }
 0x2a8   : > { %p1124_p8 = pnand %p1123_p9, %p945_p12 }
 0x2aa   : > { %p1125_p7 = pneg %p1124_p8 }
 0x2ac   : > { %p1130_p5 = pnand %p1128_p4, %p1125_p7 }
 0x2ae   : > { %1133 = shalt.err (!%p1130_p5)
}
 0x2af   : > { %935 = dma.vmem_to_hbm [thread:$0]  (%p945_p12), %s694_s28, 2048, %s1582_s5, [#allocation9], %s1191_s27, %s1191_s27, %s1192_s15  }
 0x2b0   : > { %1159 = dma.done.wait (%p945_p12), [#allocation6], 2048  }
 0x2b1   : > { %1161 = vsyncadd (%p945_p12), [#allocation6], 4294965248 }
 0x2b2   : > { %1163 = dma.done.wait (%p945_p12), [#allocation9], 2048  }
 0x2b3   : > { %1165 = vsyncadd (%p945_p12), [#allocation9], 4294965248 }
 0x2b4 PF: > { %p18_p6 = scmp.ge.s32.totalorder %s1246_s23, 5   ;;  %s1586_s18 = smov %s1172_s19 }
 0x2b5   : > { %s1587_s19 = smov %s1176_s20  ;;  %s1588_s20 = smov %s1256_s26 }
 0x2b6   : > { %s1589_s21 = smov %s1246_s23  ;;  %20 = sbr.rel (!%p18_p6) target bundleno = 5 (0x5), region = 98 }
 0x2bd   :  { %713 = vsyncpa [#allocation5], 1 }
 0x2be   :  { %715 = vsyncpa [#allocation5 + $0x1], 1 }
 0x2bf   :  { %716 = vsyncpa [#allocation6], 1 }
 0x2c0   :  { %718 = vsyncpa [#allocation6 + $0x1], 1 }
 0x2c1   :  { %719 = vsyncpa [#allocation9], 1 }

</bundles_post_ra>
